<compile_context>
chip_gen: v6e
topology: v6e:2x2x1
jax: 0.10.0
libtpu: 0.0.40
codegen_flags: <defaults>
</compile_context>

<pallas_src>
import numpy as np
import jax
import jax.numpy as jnp
from jax.experimental import pallas as pl
from jax.experimental.pallas import tpu as pltpu

HEATMAP_FACTOR = 1.0
PUSH_FACTOR = 0.001
PULL_FACTOR = 0.001


# ----------------------------- heatmap loss (tiled Pallas kernel) -----------------------------
def _make_heatmap_kernel(num_joints):
    J = num_joints

    def kernel(pred_ref, gt_ref, mask_ref, out_ref, acc_ref):
        # pred_ref : (1, 1, Jb, T) native dtype (Jb == J unless the ship-all-C fallback)
        # gt_ref   : (1, J, T)     native dtype
        # mask_ref : (1, 1, T)     native dtype
        # out_ref  : (1, 1, 1, 1)  f32 per-(batch, lane-split) partial sum
        # acc_ref  : (J, T)        f32 VMEM scratch accumulator
        t = pl.program_id(2)

        @pl.when(t == 0)
        def _init():
            acc_ref[...] = jnp.zeros_like(acc_ref)

        # Cast on the VPU (free slack in a mem-bound kernel); only heatmap channels used.
        pred = pred_ref[0, 0, :J, :].astype(jnp.float32)     # (J, T)
        gt = gt_ref[0].astype(jnp.float32)                   # (J, T)
        m = mask_ref[0].astype(jnp.float32)                  # (1, T) broadcasts over joints
        d = pred - gt
        acc_ref[...] += d * d * m                            # pure VPU elementwise accumulate

        @pl.when(t == pl.num_programs(2) - 1)
        def _finalize():
            # Cross-lane + cross-sublane reduce on the XLU (idle in this VPU/mem-bound kernel).
            row = jnp.sum(acc_ref[...], axis=1, keepdims=True)   # (J, 1)
            tot = jnp.sum(row, axis=0, keepdims=True)            # (1, 1)
            out_ref[0, 0] = tot

    return kernel


def _plan_pred_view(output, num_joints):
    """Return (pred_view, jb): a free view of `output` such that only ~J heatmap channels
    are DMA'd whenever the layout allows it."""
    B, C, H, W = output.shape
    J = num_joints
    HW = H * W
    itemsize = np.dtype(output.dtype).itemsize
    sublane_mult = 8 * max(1, 4 // itemsize)   # 8 (f32) / 16 (bf16) / 32 (int8)
    if C == 2 * J:
        # Free 4-D view; channel block index pinned to 0 -> only heatmap half is DMA'd.
        return output.reshape(B, 2, J, HW), J
    if J % sublane_mult == 0:
        # (1,1,J,T) block at channel block index 0 fetches exactly channels [0:J).
        return output.reshape(B, 1, C, HW), J
    if C > 3 * J:
        # One-time contiguous slice (~3J channel-bytes) beats shipping C channels.
        return output[:, :J].reshape(B, 1, J, HW), J
    # Ship all C channels and slice [:J] in-kernel (cheaper than the slice when C <= 3J).
    return output.reshape(B, 1, C, HW), C


def _pick_lane_tile(hw, per_lane_bytes, budget_bytes=6 * 1024 * 1024, hard_cap=4096):
    """Largest multiple of 128 dividing hw, capped by a VMEM budget; else full hw."""
    cap = min(hard_cap, max(128, (budget_bytes // max(per_lane_bytes, 1)) // 128 * 128))
    best = None
    t = 128
    while t <= min(hw, cap):
        if hw % t == 0:
            best = t
        t += 128
    return best if best is not None else hw


def _heatmap_loss(output, heatmap, mask, num_joints):
    B, C, H, W = output.shape
    J = num_joints
    HW = H * W

    # Native-dtype views (no wrapper astype: casts happen inside the kernel).
    pred_view, jb = _plan_pred_view(output, J)
    gt = heatmap.reshape(B, J, HW)
    msk = mask.reshape(B, 1, HW)

    pred_isz = np.dtype(pred_view.dtype).itemsize
    gt_isz = np.dtype(gt.dtype).itemsize
    m_isz = np.dtype(msk.dtype).itemsize
    # Double-buffered inputs + f32 accumulator, per lane.
    per_lane = 2 * (jb * pred_isz + J * gt_isz + m_isz) + 4 * J
    T = _pick_lane_tile(HW, per_lane)
    n_t = HW // T if HW % T == 0 else 1

    # Split lane tiles over a second "parallel" axis so both TensorCores get work on v7x
    # when B is small (harmless / no-op on single-TC v5e & v6e).
    P = 2 if (B < 4 and n_t % 2 == 0 and n_t >= 2) else 1
    n_inner = n_t // P

    block_bytes = 2 * T * (jb * pred_isz + J * gt_isz + m_isz) + J * T * 4
    vmem_limit = int(min(48 * 1024 * 1024, max(8 * 1024 * 1024, 3 * block_bytes)))

    partials = pl.pallas_call(
        _make_heatmap_kernel(J),
        grid=(B, P, n_inner),
        in_specs=[
            pl.BlockSpec((1, 1, jb, T), lambda b, p, t: (b, 0, 0, p * n_inner + t)),
            pl.BlockSpec((1, J, T), lambda b, p, t: (b, 0, p * n_inner + t)),
            pl.BlockSpec((1, 1, T), lambda b, p, t: (b, 0, p * n_inner + t)),
        ],
        out_specs=pl.BlockSpec((1, 1, 1, 1), lambda b, p, t: (b, p, 0, 0)),
        out_shape=jax.ShapeDtypeStruct((B, P, 1, 1), jnp.float32),
        scratch_shapes=[pltpu.VMEM((J, T), jnp.float32)],
        compiler_params=pltpu.CompilerParams(
            dimension_semantics=("parallel", "parallel", "arbitrary"),
            vmem_limit_bytes=vmem_limit,
        ),
    )(pred_view, gt, msk)

    # Tiny epilogue: combine the P per-core partials and fold the mean into one scale.
    return jnp.sum(partials, axis=(1, 2, 3)) * (HEATMAP_FACTOR / float(J * HW))


# ------------------------- associative-embedding loss (tiny Pallas kernel) ---------------------
def _ae_loss_kernel(vals_ref, vis_ref, push_ref, pull_ref):
    vals = vals_ref[...]                                     # (B, M, J) gathered tag values
    vis = vis_ref[...]                                       # (B, M, J) 0/1 visibility

    cnt = jnp.sum(vis, axis=2)                               # (B, M)
    has = (cnt > 0).astype(jnp.float32)
    safe_cnt = jnp.maximum(cnt, 1.0)
    mean_tag = jnp.sum(vals * vis, axis=2) / safe_cnt        # per-person mean tag
    pull_per = jnp.sum(vis * (vals - mean_tag[:, :, None]) ** 2, axis=2) / safe_cnt
    pull_sum = jnp.sum(pull_per * has, axis=1)               # (B,)
    num_tags = jnp.sum(has, axis=1)                          # (B,)

    dm = mean_tag[:, :, None] - mean_tag[:, None, :]         # (B, M, M)
    pair = jnp.exp(-(dm * dm)) * has[:, :, None] * has[:, None, :]
    push_raw = jnp.sum(pair, axis=(1, 2)) - num_tags         # remove diagonal

    denom = jnp.maximum((num_tags - 1.0) * num_tags, 1.0)
    push = jnp.where(num_tags >= 2.0, push_raw / denom * 0.5, 0.0)
    pull = jnp.where(num_tags >= 1.0, pull_sum / jnp.maximum(num_tags, 1.0), 0.0)

    push_ref[...] = push * PUSH_FACTOR
    pull_ref[...] = pull * PULL_FACTOR


def _ae_loss(output, joints, num_joints):
    B, C, H, W = output.shape
    J = num_joints
    M, Jk = joints.shape[1], joints.shape[2]

    # Gather the (B, M, Jk) tag values from the UN-CAST flat output (free reshape); the f32
    # cast only touches the tiny gathered values, never the full output array.  Invalid /
    # invisible indices are clipped and masked by vis (matches the PyTorch loop semantics).
    # TODO(synk): data-dependent tag gather stays in XLA (take_along_axis); a Pallas version
    # would need PrefetchScalarGridSpec indices + manual DMA from an ANY-space output ref.
    flat = output.reshape(B, C * H * W)
    idx = joints[..., 0].astype(jnp.int32).reshape(B, M * Jk) + J * H * W
    idx = jnp.clip(idx, 0, C * H * W - 1)
    vals = jnp.take_along_axis(flat, idx, axis=1).reshape(B, M, Jk).astype(jnp.float32)
    vis = (joints[..., 1] > 0).astype(jnp.float32)

    def full_spec(shape):
        return pl.BlockSpec(shape, lambda i, n=len(shape): (0,) * n)

    push, pull = pl.pallas_call(
        _ae_loss_kernel,
        grid=(1,),
        in_specs=[full_spec((B, M, Jk)), full_spec((B, M, Jk))],
        out_specs=(full_spec((B,)), full_spec((B,))),
        out_shape=(jax.ShapeDtypeStruct((B,), jnp.float32),
                   jax.ShapeDtypeStruct((B,), jnp.float32)),
        compiler_params=pltpu.CompilerParams(dimension_semantics=("arbitrary",)),
    )(vals, vis)
    return push, pull


# ------------------------------------- public forward ------------------------------------------
def multi_loss_factory_forward(outputs, heatmaps, masks, joints, num_joints):
    """JAX/Pallas equivalent of MultiLossFactory.forward (num_stages == 1)."""
    assert isinstance(outputs, list) and isinstance(heatmaps, list)
    assert isinstance(masks, list) and isinstance(joints, list)
    assert len(outputs) == 1 == len(heatmaps) == len(masks) == len(joints)
    heatmaps_losses, push_losses, pull_losses = [], [], []
    for idx in range(len(outputs)):
        hm_l = _heatmap_loss(outputs[idx], heatmaps[idx], masks[idx], num_joints)
        push_l, pull_l = _ae_loss(outputs[idx], joints[idx], num_joints)
        heatmaps_losses.append(hm_l)
        push_losses.append(push_l)
        pull_losses.append(pull_l)
    return heatmaps_losses, push_losses, pull_losses


# ------------------------------------ pure numpy reference -------------------------------------
def _reference(output, heatmap, mask, joints, num_joints):
    output = np.asarray(output, np.float32)
    heatmap = np.asarray(heatmap, np.float32)
    mask = np.asarray(mask, np.float32)
    joints = np.asarray(joints)
    B = output.shape[0]
    pred = output[:, :num_joints]
    hm = (((pred - heatmap) ** 2) * mask[:, None, :, :]).mean(axis=(1, 2, 3)) * HEATMAP_FACTOR
    tags = output[:, num_joints:].reshape(B, -1)
    pushes, pulls = [], []
    for b in range(B):
        person_means, pull = [], 0.0
        for p in range(joints.shape[1]):
            tmp = [tags[b, joints[b, p, j, 0]] for j in range(joints.shape[2])
                   if joints[b, p, j, 1] > 0]
            if len(tmp) == 0:
                continue
            tmp = np.asarray(tmp, np.float32)
            m = tmp.mean()
            person_means.append(m)
            pull += ((tmp - m) ** 2).mean()
        n = len(person_means)
        if n == 0:
            push, pul = 0.0, 0.0
        elif n == 1:
            push, pul = 0.0, pull / n
        else:
            tt = np.asarray(person_means, np.float32)
            d = tt[:, None] - tt[None, :]
            push = (np.exp(-(d ** 2)).sum() - n) / ((n - 1) * n) * 0.5
            pul = pull / n
        pushes.append(push * PUSH_FACTOR)
        pulls.append(pul * PULL_FACTOR)
    return hm, np.asarray(pushes, np.float32), np.asarray(pulls, np.float32)


# -------------------------------------------- test ---------------------------------------------
def _run_case(case_idx, num_joints, B, C, H, W, M, dtype=jnp.float32):
    key = jax.random.fold_in(jax.random.PRNGKey(0), case_idx)
    k1, k2, k3, k4, k5 = jax.random.split(key, 5)
    output = jax.random.normal(k1, (B, C, H, W), dtype=jnp.float32).astype(dtype)
    heatmap = jax.random.uniform(k2, (B, num_joints, H, W), dtype=jnp.float32).astype(dtype)
    mask = (jax.random.uniform(k3, (B, H, W)) > 0.3).astype(jnp.float32)
    n_tag = (C - num_joints) * H * W
    jidx = jax.random.randint(k4, (B, M, num_joints), 0, n_tag, dtype=jnp.int32)
    jvis = jax.random.bernoulli(k5, 0.6, (B, M, num_joints)).astype(jnp.int32)
    jvis = jvis.at[:, -1, :].set(0)            # one fully-invisible person (has==0 path)
    joints = jnp.stack([jidx, jvis], axis=-1)  # (B, M, J, 2)

    hm_ls, push_ls, pull_ls = multi_loss_factory_forward(
        [output], [heatmap], [mask], [joints], num_joints)
    hm_l = jax.block_until_ready(hm_ls[0])
    push_l = jax.block_until_ready(push_ls[0])
    pull_l = jax.block_until_ready(pull_ls[0])

    # Reference is computed on the up-cast values (the kernel casts bf16->f32 before compute).
    ref_hm, ref_push, ref_pull = _reference(
        np.asarray(output.astype(jnp.float32)),
        np.asarray(heatmap.astype(jnp.float32)),
        np.asarray(mask), np.asarray(joints), num_joints)
    np.testing.assert_allclose(np.asarray(hm_l), ref_hm, rtol=2e-4, atol=1e-5)
    np.testing.assert_allclose(np.asarray(push_l), ref_push, rtol=2e-4, atol=1e-6)
    np.testing.assert_allclose(np.asarray(pull_l), ref_pull, rtol=2e-4, atol=1e-6)


if __name__ == "__main__":
    # Case 1: canonical C == 2*J fast path, single lane tile (H*W = 256).
    _run_case(0, num_joints=4, B=2, C=8, H=16, W=16, M=8)
    # Case 2: C == 2*J, H*W = 16384 -> T=4096, 4 lane tiles -> P=2 parallel splits x 2
    #         accumulation steps with the fused in-kernel reduction.
    _run_case(1, num_joints=3, B=2, C=6, H=128, W=128, M=8)
    # Case 3: generic C != 2*J with C <= 3J and J%8 != 0 -> ship-all-C + in-kernel slice path.
    _run_case(2, num_joints=4, B=2, C=10, H=16, W=16, M=8)
    # Case 4: generic C != 2*J with J multiple of 8 -> direct (1,1,J,T) channel-block-0 path.
    _run_case(3, num_joints=8, B=2, C=18, H=16, W=16, M=8)
    # Case 5: generic C > 3*J, J%8 != 0 -> one-time wrapper slice path.
    _run_case(4, num_joints=4, B=2, C=20, H=16, W=16, M=8)
    # Case 6: bf16 inputs -> native-dtype DMA + in-kernel VPU cast to f32.
    _run_case(5, num_joints=4, B=1, C=8, H=32, W=32, M=8, dtype=jnp.bfloat16)
    print("KERNEL_OK")
</pallas_src>

<mosaic_0001>
module attributes {stable_mosaic.version = 11 : i64} {
  func.func @kernel(%arg0: i32, %arg1: i32, %arg2: i32, %arg3: memref<1x1x4x256xf32, #tpu.memory_space<vmem>>, %arg4: memref<1x4x256xf32, #tpu.memory_space<vmem>>, %arg5: memref<1x1x256xf32, #tpu.memory_space<vmem>>, %arg6: memref<1x1x1x1xf32, #tpu.memory_space<vmem>>, %arg7: memref<4x256xf32, #tpu.memory_space<vmem>>) attributes {dimension_semantics = [#tpu.dimension_semantics<parallel>, #tpu.dimension_semantics<parallel>, #tpu.dimension_semantics<arbitrary>], iteration_bounds = array<i64: 2, 1, 1>, scalar_prefetch = 0 : i64, scratch_operands = 1 : i64, tpu.core_type = #tpu.core_type<tc>, window_params = [{transform_indices = @transform_0, window_bounds = array<i64: 1, 1, 4, 256>}, {transform_indices = @transform_1, window_bounds = array<i64: 1, 4, 256>}, {transform_indices = @transform_2, window_bounds = array<i64: 1, 1, 256>}, {transform_indices = @transform_3, window_bounds = array<i64: 1, 1, 1, 1>}]} {
    %c0_i32 = arith.constant 0 : i32
    %0 = arith.cmpi eq, %arg2, %c0_i32 : i32
    %1 = arith.extui %0 : i1 to i32
    %c0_i32_0 = arith.constant 0 : i32
    %2 = arith.cmpi ne, %1, %c0_i32_0 : i32
    scf.if %2 {
      %cst = arith.constant 0.000000e+00 : f32
      %19 = vector.broadcast %cst : f32 to vector<4x256xf32>
      %c0_16 = arith.constant 0 : index
      %c0_17 = arith.constant 0 : index
      %20 = vector.load %arg7[%c0_16, %c0_17] : memref<4x256xf32, #tpu.memory_space<vmem>>, vector<4x256xf32>
      tpu.vector_store %arg7[%c0_16, %c0_17], %19 {strides = array<i32>} : memref<4x256xf32, #tpu.memory_space<vmem>>, vector<4x256xf32>,
    } else {
    }
    %c0 = arith.constant 0 : index
    %c0_1 = arith.constant 0 : index
    %c0_2 = arith.constant 0 : index
    %c0_3 = arith.constant 0 : index
    %3 = vector.load %arg3[%c0, %c0_1, %c0_2, %c0_3] : memref<1x1x4x256xf32, #tpu.memory_space<vmem>>, vector<1x1x4x256xf32>
    %4 = vector.shape_cast %3 : vector<1x1x4x256xf32> to vector<4x256xf32>
    %c0_4 = arith.constant 0 : index
    %c0_5 = arith.constant 0 : index
    %c0_6 = arith.constant 0 : index
    %5 = vector.load %arg4[%c0_4, %c0_5, %c0_6] : memref<1x4x256xf32, #tpu.memory_space<vmem>>, vector<1x4x256xf32>
    %6 = vector.shape_cast %5 : vector<1x4x256xf32> to vector<4x256xf32>
    %c0_7 = arith.constant 0 : index
    %c0_8 = arith.constant 0 : index
    %c0_9 = arith.constant 0 : index
    %7 = vector.load %arg5[%c0_7, %c0_8, %c0_9] : memref<1x1x256xf32, #tpu.memory_space<vmem>>, vector<1x1x256xf32>
    %8 = vector.shape_cast %7 : vector<1x1x256xf32> to vector<1x256xf32>
    %9 = arith.subf %4, %6 : vector<4x256xf32>
    %c0_10 = arith.constant 0 : index
    %c0_11 = arith.constant 0 : index
    %10 = vector.load %arg7[%c0_10, %c0_11] : memref<4x256xf32, #tpu.memory_space<vmem>>, vector<4x256xf32>
    %11 = arith.mulf %9, %9 : vector<4x256xf32>
    %12 = vector.broadcast %8 : vector<1x256xf32> to vector<4x256xf32>
    %13 = arith.mulf %11, %12 : vector<4x256xf32>
    %14 = arith.addf %10, %13 : vector<4x256xf32>
    %c0_12 = arith.constant 0 : index
    %c0_13 = arith.constant 0 : index
    %15 = vector.load %arg7[%c0_12, %c0_13] : memref<4x256xf32, #tpu.memory_space<vmem>>, vector<4x256xf32>
    tpu.vector_store %arg7[%c0_12, %c0_13], %14 {strides = array<i32>} : memref<4x256xf32, #tpu.memory_space<vmem>>, vector<4x256xf32>,
    %c0_i32_14 = arith.constant 0 : i32
    %16 = arith.cmpi eq, %arg2, %c0_i32_14 : i32
    %17 = arith.extui %16 : i1 to i32
    %c0_i32_15 = arith.constant 0 : i32
    %18 = arith.cmpi ne, %17, %c0_i32_15 : i32
    scf.if %18 {
      %c0_16 = arith.constant 0 : index
      %c0_17 = arith.constant 0 : index
      %19 = vector.load %arg7[%c0_16, %c0_17] : memref<4x256xf32, #tpu.memory_space<vmem>>, vector<4x256xf32>
      %cst = arith.constant dense<0.000000e+00> : vector<4xf32>
      %20 = vector.multi_reduction <add>, %19, %cst [1] : vector<4x256xf32> to vector<4xf32>
      %21 = vector.shape_cast %20 : vector<4xf32> to vector<4x1xf32>
      %cst_18 = arith.constant dense<0.000000e+00> : vector<1xf32>
      %22 = vector.multi_reduction <add>, %21, %cst_18 [0] : vector<4x1xf32> to vector<1xf32>
      %23 = vector.shape_cast %22 : vector<1xf32> to vector<1x1xf32>
      %c0_19 = arith.constant 0 : index
      %c0_20 = arith.constant 0 : index
      %c0_21 = arith.constant 0 : index
      %c0_22 = arith.constant 0 : index
      %24 = vector.load %arg6[%c0_19, %c0_20, %c0_21, %c0_22] : memref<1x1x1x1xf32, #tpu.memory_space<vmem>>, vector<1x1x1x1xf32>
      %25 = vector.shape_cast %24 : vector<1x1x1x1xf32> to vector<1x1xf32>
      %26 = vector.shape_cast %23 : vector<1x1xf32> to vector<1x1x1x1xf32>
      tpu.vector_store %arg6[%c0_19, %c0_20, %c0_21, %c0_22], %26 {strides = array<i32>} : memref<1x1x1x1xf32, #tpu.memory_space<vmem>>, vector<1x1x1x1xf32>,
    } else {
    }
    return
  }
  func.func @transform_0(%arg0: i32, %arg1: i32, %arg2: i32) -> (i32, i32, i32, i32) {
    %c1_i32 = arith.constant 1 : i32
    %0 = arith.muli %arg1, %c1_i32 : i32
    %1 = arith.addi %0, %arg2 : i32
    %c0_i32 = arith.constant 0 : i32
    %c0_i32_0 = arith.constant 0 : i32
    %c0_i32_1 = arith.constant 0 : i32
    return %arg0, %c0_i32, %c0_i32_0, %1 : i32, i32, i32, i32
  }
  func.func @transform_1(%arg0: i32, %arg1: i32, %arg2: i32) -> (i32, i32, i32) {
    %c1_i32 = arith.constant 1 : i32
    %0 = arith.muli %arg1, %c1_i32 : i32
    %1 = arith.addi %0, %arg2 : i32
    %c0_i32 = arith.constant 0 : i32
    %c0_i32_0 = arith.constant 0 : i32
    return %arg0, %c0_i32, %1 : i32, i32, i32
  }
  func.func @transform_2(%arg0: i32, %arg1: i32, %arg2: i32) -> (i32, i32, i32) {
    %c1_i32 = arith.constant 1 : i32
    %0 = arith.muli %arg1, %c1_i32 : i32
    %1 = arith.addi %0, %arg2 : i32
    %c0_i32 = arith.constant 0 : i32
    %c0_i32_0 = arith.constant 0 : i32
    return %arg0, %c0_i32, %1 : i32, i32, i32
  }
  func.func @transform_3(%arg0: i32, %arg1: i32, %arg2: i32) -> (i32, i32, i32, i32) {
    %c0_i32 = arith.constant 0 : i32
    %c0_i32_0 = arith.constant 0 : i32
    %c0_i32_1 = arith.constant 0 : i32
    return %arg0, %arg1, %c0_i32, %c0_i32_0 : i32, i32, i32, i32
  }
}

</mosaic_0001>

<bundles_post_ra>
// kernel: tpu_custom_call.1
= control target key start
LH: loop header
LB: loop body
LE: loop exit
PB: predicated region body
PF: predicated region fallthrough
CT: control target
= control target key end

     0   :  { %8 = vsyncpa [#allocation4], 0  ;;  %s881_s0 = inlined_call_operand.hbm [shape: f32[2,2,4,256], index: 0, kind: input, shape index: {}]   ;;  %s882_s1 = inlined_call_operand.hbm [shape: f32[2,4,256], index: 1, kind: input, shape index: {}]   ;;  %s883_s2 = inlined_call_operand.hbm [shape: f32[2,1,256], index: 2, kind: input, shape index: {}]   ;;  %s884_s3 = inlined_call_operand.vmem [shape: f32[2,1,1,1], index: 3, kind: output, shape index: {}]  }
   0x1   :  { %10 = vsyncpa [#allocation4 + $0x1], 0 }
   0x2   :  { %11 = vsyncpa [#allocation6], 0 }
   0x3   :  { %13 = vsyncpa [#allocation6 + $0x1], 0  ;;  %s744_s12 = smov 0   ;;  %s746_s13 = smov 0  }
   0x4   :  { %s748_s14 = smov 0   ;;  %s750_s15 = smov 0  }
   0x5   :  { %s752_s16 = smov 0   ;;  %s754_s17 = smov 0  }
   0x6 LB: > { %s494_s18 = sadd.s32 4294967295, %s719_s17   ;;  %s38_s19 = sadd.s32 1, %s715_s16  ;;  %s719_s17 = sphi %s754_s17, %s19_s17   ;;  %s715_s16 = sphi %s752_s16, %s892_s16   ;;  %s711_s15 = sphi %s750_s15, %s891_s15   ;;  %s707_s14 = sphi %s748_s14, %s890_s14   ;;  %s703_s13 = sphi %s746_s13, %s889_s13   ;;  %s699_s12 = sphi %s744_s12, %s888_s12  }
   0x7   : > { %p40_p0 = scmp.ge.s32.totalorder %s38_s19, 2  ;;  %s49_s20 = sadd.s32 1, %s707_s14 }
   0x8   : > { %p56_p1 = scmp.ne.s32.totalorder %s707_s14, %s703_s13  ;;  %p57_p2 = scmp.eq.s32.totalorder %s719_s17, 0 }
   0x9   : > { %s894_s19 = smov (%p40_p0, %s38_s19), 0  ;;  %p62_p4 = scmp.ne.s32.totalorder %s703_s13, %s699_s12 }
   0xa   : > { %p58_p3 = por %p57_p2, %p56_p1  ;;  %s44_s21 = ssub.s32 %s715_s16, %s894_s19 }
   0xb   : > { %p63_p5 = scmp.eq.s32.totalorder %s494_s18, 0  ;;  %p47_p6 = scmp.eq.s32.totalorder %s44_s21, 0 }
   0xc   : > { %p532_p8 = scmp.lt.s32.totalorder %s719_s17, 2  ;;  %s794_s24 = sand.u32 1, %s707_s14  }
   0xd   : > { %p785_p7 = por %p63_p5, %p62_p4  ;;  %s498_s26 = sshll.u32 %s794_s24, 3 }
   0xe   : > { %s791_s23 = scalar_select %p47_p6, %s707_s14, %s49_s20  }
   0xf   : > { %p796_p9 = pnand %p532_p8, %p58_p3  ;;  %s196_s27 = sand.u32 1, %s719_s17  }
  0x10   : > { %s514_s28 = sshll.u32 %s715_s16, 7  ;;  %s200_s5 = scalar_lea.vmem [#allocation5], %s498_s26 }
  0x11   : > { %s209_s4 = scalar_lea.hbm %s882_s1, %s514_s28  ;;  %s211_s6 = sshll.u32 %s200_s5, 4  ;;  %s212_s6 = int_to_ptr.vmem [resolvable:$true] %s211_s6 }
  0x12   : > { %p507_p10 = scmp.ge.s32.totalorder %s719_s17, 1  ;;  %s807_s7 = scalar_lea.sflag [#allocation6], %s196_s27 }
  0x13   : > { %p583_p11 = pneg %p796_p9  ;;  %s594_s8 = scalar_lea.vmem %s212_s6, 128 }
  0x14   : > { %p595_p12 = scmp.ne.s32.totalorder %s212_s6, %s594_s8  ;;  %s721_s9 = smov [#allocation5]  }
  0x15   : > { %s599_s10 = sshll.u32 %s721_s9, 4  ;;  %s600_s10 = int_to_ptr.vmem [resolvable:$false] %s599_s10 }
  0x16   : > { %p597_p13 = pnand %p595_p12, %p583_p11  ;;  %s601_s11 = scalar_lea.vmem %s600_s10, 256 }
  0x17   : > { %p602_p1 = scmp.lt.s32.totalorder %s212_s6, %s600_s10  ;;  %p603_p2 = scmp.lt.s32.totalorder %s601_s11, %s594_s8 }
  0x18   : > { %p598_p0 = pneg %p597_p13 }
  0x19   : > { %p604_p3 = por %p603_p2, %p602_p1 }
  0x1b   : > { %p605_p4 = pnand %p604_p3, %p598_p0 }
  0x1d   : > { %608 = shalt.err (!%p605_p4)
}
  0x1e   : > { %528 = dma.hbm_to_vmem [thread:$0]  (!%p796_p9), %s209_s4, 128, %s212_s6, %s807_s7  }
  0x1f   : > { %p238_p5 = scmp.lt.s32.totalorder %s719_s17, 3  ;;  %s513_s20 = sshll.u32 %s715_s16, 8 }
  0x20   : > { %s178_s21 = scalar_lea.vmem [#allocation3], %s498_s26  ;;  %s187_s30 = scalar_lea.hbm %s881_s0, %s513_s20 }
  0x21   : > { %p820_p6 = pnand %p507_p10, %p238_p5  ;;  %s189_s27 = sshll.u32 %s178_s21, 4  ;;  %s190_s27 = int_to_ptr.vmem [resolvable:$true] %s189_s27 }
  0x22   : > { %s175_s5 = scalar_lea.sflag [#allocation4], %s794_s24  ;;  %s622_s8 = scalar_lea.vmem %s190_s27, 128 }
  0x23   : > { %p623_p8 = scmp.ne.s32.totalorder %s190_s27, %s622_s8  ;;  %s722_s4 = smov [#allocation3]  }
  0x24   : > { %s627_s6 = sshll.u32 %s722_s4, 4  ;;  %s628_s6 = int_to_ptr.vmem [resolvable:$false] %s627_s6 }
  0x25   : > { %p625_p12 = pnand %p623_p8, %p583_p11  ;;  %s629_s9 = scalar_lea.vmem %s628_s6, 256 }
  0x26   : > { %p630_p10 = scmp.lt.s32.totalorder %s190_s27, %s628_s6  ;;  %p631_p0 = scmp.lt.s32.totalorder %s629_s9, %s622_s8 }
  0x27   : > { %p626_p13 = pneg %p625_p12 }
  0x28   : > { %p632_p1 = por %p631_p0, %p630_p10 }
  0x2a   : > { %p633_p2 = pnand %p632_p1, %p626_p13 }
  0x2c   : > { %636 = shalt.err (!%p633_p2)
}
  0x2d   : > { %525 = dma.hbm_to_vmem [thread:$0]  (!%p796_p9), %s187_s30, 128, %s190_s27, %s175_s5  }
  0x2e   : > { %s504_s26 = sshll.u32 %s794_s24, 1  ;;  %s515_s10 = sshll.u32 %s715_s16, 5 }
  0x2f   : > { %s231_s21 = scalar_lea.hbm %s883_s2, %s515_s10  ;;  %s222_s28 = scalar_lea.vmem [#allocation7], %s504_s26 }
  0x30   : > { %s233_s29 = sshll.u32 %s222_s28, 4  ;;  %s723_s8 = smov [#allocation7]   ;;  %s234_s29 = int_to_ptr.vmem [resolvable:$true] %s233_s29 }
  0x31   : > { %s650_s4 = scalar_lea.vmem %s234_s29, 32  ;;  %s655_s6 = sshll.u32 %s723_s8, 4  ;;  %s656_s6 = int_to_ptr.vmem [resolvable:$false] %s655_s6 }
  0x32   : > { %p651_p3 = scmp.ne.s32.totalorder %s234_s29, %s650_s4  ;;  %s657_s9 = scalar_lea.vmem %s656_s6, 64 }
  0x33   : > { %p658_p8 = scmp.lt.s32.totalorder %s234_s29, %s656_s6  ;;  %p659_p12 = scmp.lt.s32.totalorder %s657_s9, %s650_s4 }
  0x34   : > { %p653_p4 = pnand %p651_p3, %p583_p11 }
  0x35   : > { %p660_p13 = por %p659_p12, %p658_p8 }
  0x36   : > { %p654_p5 = pneg %p653_p4 }
  0x38   : > { %p661_p10 = pnand %p660_p13, %p654_p5 }
  0x3a   : > { %664 = shalt.err (!%p661_p10)
}
  0x3b   : > { %531 = dma.hbm_to_vmem [thread:$0]  (!%p796_p9), %s231_s21, 32, %s234_s29, %s807_s7  }
  0x3c   : > { %242 = sbr.rel (%p820_p6) target bundleno = 238 (0xee), region = 32  ;;  %s244_s24 = sand.u32 (!%p820_p6), 1, %s703_s13  }
  0x3d   : > { %s508_s27 = sshll.u32 (!%p820_p6), %s244_s24, 3  ;;  %s245_s30 = scalar_lea.sflag (!%p820_p6), [#allocation4], %s244_s24 }
  0x3e   : > { %s248_s5 = scalar_lea.vmem (!%p820_p6), [#allocation3], %s508_s27 }
  0x41   : > { %690 = dma.done.wait (%p785_p7), %s245_s30, 128  }
  0x42   : > { %692 = vsyncadd (%p785_p7), %s245_s30, 4294967168  ;;  %s253_s25 = sand.u32 1, %s494_s18   ;;  %s257_s7 = scalar_lea.vmem [#allocation5], %s508_s27 }
  0x43   : > { %s254_s26 = scalar_lea.sflag [#allocation6], %s253_s25 }
  0x44   : > { %694 = dma.done.wait (%p785_p7), %s254_s26, 160  }
  0x45   : > { %696 = vsyncadd (%p785_p7), %s254_s26, 4294967136  ;;  %v324_v0 = vlaneseq  ;;  %s510_s12 = sshll.u32 %s244_s24, 1  ;;  %v317_v4 = vld [vmem:[%s248_s5] sm:$0xff]  ;;  %v318_v5 = vld [vmem:[%s257_s7] sm:$0xff]  ;;  %vm344_vm0 = vcmask 1043456   ;;  %p306_p7 = scmp.lt.s32.totalorder %s711_s15, 1 }
  0x46   : > { %s266_s10 = scalar_lea.vmem [#allocation7], %s510_s12  ;;  %v320_v7 = vsub.f32 %v317_v4, %v318_v5  ;;  %vm357_vm1 = vcmask 0  }
  0x47   : > { %v325_v1 = vshrl.u32 %v324_v0, 7  ;;  %v319_v6 = vld [vmem:[%s266_s10] sm:$0x3]  ;;  %s896_s15 = smov (!%p306_p7, %s711_s15), 1 }
  0x48   : > { %v322_v10 = vmul.f32 %v320_v7, %v320_v7  ;;  %s311_s11 = scalar_lea.vmem %s884_s3, %s896_s15 }
  0x49   : > { %v326_v2 = vsub.s32 0, %v325_v1  ;;  %v330_v3 = vsub.s32 1, %v325_v1 }
  0x4b   : > { %v327_v8 = vrot.slane %v319_v6, %v326_v2  ;;  %v331_v9 = vrot.slane %v319_v6, %v330_v3 }
  0x4d   : > { %v332_v11 = vcombine.low %v327_v8, %v331_v9 }
  0x4f   : > { %v334_v12 = vmul.f32 %v332_v11, %v322_v10 }
  0x51   : > { %v342_v13 = vcombine.high %v334_v12, %v334_v12  ;;  %v345_v14 = vsel %vm344_vm0, %v334_v12, 0.0 }
  0x53   : > { %v346_v15 = vsel %vm344_vm0, %v342_v13, 0.0 }
  0x54   : > { %v347_v16 = vadd.f32 %v346_v15, %v345_v14 }
  0x56   : > { %348 = vadd.xlane.f32.xlu0 %v347_v16 }
  0xdf   : > { %v349_v17 = vpop.xlane.xlu0 %348 }
  0xe0   : > { %v350_v18 = vsel %vm344_vm0, %v349_v17, 0.0 }
  0xe1   : > { %v351_v19 = vrot.slane %v350_v18, 4 }
  0xe3   : > { %v352_v20 = vadd.f32 %v351_v19, %v350_v18 }
  0xe5   : > { %v353_v21 = vrot.slane %v352_v20, 2 }
  0xe7   : > { %v354_v22 = vadd.f32 %v353_v21, %v352_v20 }
  0xe9   : > { %v355_v23 = vrot.slane %v354_v22, 1 }
  0xeb   : > { %v356_v24 = vadd.f32 %v355_v23, %v354_v22 }
  0xed   : > { %358 = vst.msk [vmem:[%s311_s11] sm:$0x1] %vm357_vm1, %v356_v24 }
  0xee PF: > { %s19_s17 = sadd.s32 1, %s719_s17   ;;  %s888_s12 = smov %s703_s13 }
  0xef   : > { %p16_p9 = scmp.ge.s32.totalorder %s19_s17, 4   ;;  %s889_s13 = smov %s707_s14 }
  0xf0   : > { %s890_s14 = smov %s791_s23  ;;  %s891_s15 = smov %s715_s16 }
  0xf1   : > { %s892_s16 = smov %s894_s19  ;;  %18 = sbr.rel (!%p16_p9) target bundleno = 6 (0x6), region = 104 }
  0xf6   :  { %382 = vsyncpa [#allocation4], 1 }
  0xf7   :  { %384 = vsyncpa [#allocation4 + $0x1], 1 }
  0xf8   :  { %385 = vsyncpa [#allocation6], 1 }
  0xf9   :  { %387 = vsyncpa [#allocation6 + $0x1], 1 }

</bundles_post_ra>
